<compile_context>
chip_gen: v5e
topology: v5e:2x2
jax: 0.10.0
libtpu: 0.0.40
codegen_flags: <defaults>
</compile_context>

<pallas_src>
import math

import jax
import jax.numpy as jnp
from jax.experimental import pallas as pl
from jax.experimental.pallas import tpu as pltpu


def gsr_kernel(w_ref, ut_ref, x_ref, adj_ref, xo_ref):
    """Hot path: two MXU matmuls + Gram matmul + elementwise abs / diag-fill."""
    hr = w_ref.shape[0]
    lr = ut_ref.shape[0]

    # a = W @ [I; I]  ==  W[:, :lr] + W[:, lr:]   (VPU, no MXU matmul)   (hr, lr) f32
    a = w_ref[:, :lr] + w_ref[:, lr:]

    # P = U^T @ X   (lr, hr)  — lane-dense last dim; bf16 operands, f32 accumulate.
    p = jnp.dot(ut_ref[...], x_ref[...], preferred_element_type=jnp.float32)

    # f_d = | a @ P |   (hr, hr)  — bf16 MXU operands, f32 accumulate.
    f_d = jnp.abs(
        jnp.dot(a.astype(jnp.bfloat16), p.astype(jnp.bfloat16),
                preferred_element_type=jnp.float32))

    # fill_diagonal_(1)
    row = jax.lax.broadcasted_iota(jnp.int32, (hr, hr), 0)
    col = jax.lax.broadcasted_iota(jnp.int32, (hr, hr), 1)
    diag = row == col
    adj = jnp.where(diag, jnp.float32(1.0), f_d)
    adj_ref[...] = adj

    # Xo = adj @ adj^T : contract axis 1 with axis 1 -> no transpose materialized.
    # (Xo + Xo^T)/2 and the final abs are exact no-ops (Gram of a nonnegative matrix),
    # so only the diag fill remains.
    xo = jax.lax.dot_general(
        adj, adj,
        dimension_numbers=(((1,), (1,)), ((), ())),
        preferred_element_type=jnp.float32)
    xo_ref[...] = jnp.where(diag, jnp.float32(1.0), xo)


def gsr_layer(A, X, weights):
    """GSRLayer.forward(A, X) with parameter `weights` of shape (hr, hr)."""
    A = A.astype(jnp.float32)
    X = X.astype(jnp.float32)
    weights = weights.astype(jnp.float32)

    lr_dim = A.shape[0]
    hr_dim = weights.shape[0]
    assert hr_dim == 2 * lr_dim, "GSRLayer requires hr_dim == 2 * lr_dim"
    assert X.shape == (lr_dim, hr_dim)

    # TODO(synk): symmetric eigendecomposition (torch.symeig) has no Pallas
    # equivalent; computed with jnp.linalg.eigh in plain JAX glue. This eigh
    # dominates end-to-end latency, not the kernel.
    _, U_lr = jnp.linalg.eigh(A, UPLO="U")
    # bf16 MXU operands (f32 accumulation happens in-kernel); W stays f32 so the
    # slice-add runs as a plain f32 VPU op on all generations (incl. v5e).
    U_lr_T = U_lr.T.astype(jnp.bfloat16)
    X_bf16 = X.astype(jnp.bfloat16)

    adj, x_out = pl.pallas_call(
        gsr_kernel,
        out_shape=(
            jax.ShapeDtypeStruct((hr_dim, hr_dim), jnp.float32),
            jax.ShapeDtypeStruct((hr_dim, hr_dim), jnp.float32),
        ),
        in_specs=[
            pl.BlockSpec(memory_space=pltpu.MemorySpace.VMEM),  # W   (hr, hr) f32
            pl.BlockSpec(memory_space=pltpu.MemorySpace.VMEM),  # U^T (lr, lr) bf16
            pl.BlockSpec(memory_space=pltpu.MemorySpace.VMEM),  # X   (lr, hr) bf16
        ],
        out_specs=(
            pl.BlockSpec(memory_space=pltpu.MemorySpace.VMEM),  # adj (hr, hr) f32
            pl.BlockSpec(memory_space=pltpu.MemorySpace.VMEM),  # Xo  (hr, hr) f32
        ),
    )(weights, U_lr_T, X_bf16)
    return adj, x_out


def init_gsr_weights(key, hr_dim):
    """weight_variable_glorot(hr_dim): uniform(-r, r), r = sqrt(6 / (2*hr_dim))."""
    init_range = math.sqrt(6.0 / (hr_dim + hr_dim))
    return jax.random.uniform(
        key, (hr_dim, hr_dim), minval=-init_range, maxval=init_range,
        dtype=jnp.float32)


if __name__ == "__main__":
    lr_dim, hr_dim = 64, 128  # hr_dim must equal 2 * lr_dim

    key = jax.random.PRNGKey(0)
    k_a, k_x, k_w = jax.random.split(key, 3)

    # Symmetric low-resolution adjacency matrix A.
    M = jax.random.uniform(k_a, (lr_dim, lr_dim), dtype=jnp.float32)
    A = (M + M.T) * 0.5
    # Node features X (output of the preceding GCN in AGSR-Net).
    X = jax.random.normal(k_x, (lr_dim, hr_dim), dtype=jnp.float32)
    # Deterministic glorot-uniform parameter.
    W = init_gsr_weights(k_w, hr_dim)

    adj, x_out = gsr_layer(A, X, W)
    jax.block_until_ready((adj, x_out))

    assert adj.shape == (hr_dim, hr_dim) and x_out.shape == (hr_dim, hr_dim)
    print("KERNEL_OK")
</pallas_src>

<mosaic_0001>
module attributes {stable_mosaic.version = 11 : i64} {
  func.func @gsr_kernel(%arg0: memref<128x128xf32, #tpu.memory_space<vmem>>, %arg1: memref<64x64xbf16, #tpu.memory_space<vmem>>, %arg2: memref<64x128xbf16, #tpu.memory_space<vmem>>, %arg3: memref<128x128xf32, #tpu.memory_space<vmem>>, %arg4: memref<128x128xf32, #tpu.memory_space<vmem>>) attributes {dimension_semantics = [], scalar_prefetch = 0 : i64, scratch_operands = 0 : i64, tpu.core_type = #tpu.core_type<tc>} {
    %c0 = arith.constant 0 : index
    %c0_0 = arith.constant 0 : index
    %0 = vector.load %arg0[%c0, %c0_0] : memref<128x128xf32, #tpu.memory_space<vmem>>, vector<128x64xf32>
    %c0_1 = arith.constant 0 : index
    %c64 = arith.constant 64 : index
    %1 = vector.load %arg0[%c0_1, %c64] : memref<128x128xf32, #tpu.memory_space<vmem>>, vector<128x64xf32>
    %2 = arith.addf %0, %1 : vector<128x64xf32>
    %c0_2 = arith.constant 0 : index
    %c0_3 = arith.constant 0 : index
    %3 = vector.load %arg1[%c0_2, %c0_3] : memref<64x64xbf16, #tpu.memory_space<vmem>>, vector<64x64xbf16>
    %c0_4 = arith.constant 0 : index
    %c0_5 = arith.constant 0 : index
    %4 = vector.load %arg2[%c0_4, %c0_5] : memref<64x128xbf16, #tpu.memory_space<vmem>>, vector<64x128xbf16>
    %cst = arith.constant dense<0.000000e+00> : vector<64x128xf32>
    %5 = tpu.matmul %3, %4, %cst {dimension_numbers = #tpu.dot_dimension_numbers<[1], [0], [0], [1], [0, 0, 1, 1], [], []>} : vector<64x64xbf16>, vector<64x128xbf16>, vector<64x128xf32> -> vector<64x128xf32>
    %6 = arith.truncf %2 : vector<128x64xf32> to vector<128x64xbf16>
    %7 = arith.truncf %5 : vector<64x128xf32> to vector<64x128xbf16>
    %cst_6 = arith.constant dense<0.000000e+00> : vector<128x128xf32>
    %8 = tpu.matmul %6, %7, %cst_6 {dimension_numbers = #tpu.dot_dimension_numbers<[1], [0], [0], [1], [0, 0, 1, 1], [], []>} : vector<128x64xbf16>, vector<64x128xbf16>, vector<128x128xf32> -> vector<128x128xf32>
    %9 = math.absf %8 : vector<128x128xf32>
    %10 = tpu.iota {dimensions = array<i32: 0>} : vector<128x128xi32>
    %11 = tpu.iota {dimensions = array<i32: 1>} : vector<128x128xi32>
    %12 = arith.cmpi eq, %10, %11 : vector<128x128xi32>
    %cst_7 = arith.constant 1.000000e+00 : f32
    %13 = vector.broadcast %cst_7 : f32 to vector<128x128xf32>
    %14 = arith.select %12, %13, %9 : vector<128x128xi1>, vector<128x128xf32>
    %c0_8 = arith.constant 0 : index
    %c0_9 = arith.constant 0 : index
    %15 = vector.load %arg3[%c0_8, %c0_9] : memref<128x128xf32, #tpu.memory_space<vmem>>, vector<128x128xf32>
    tpu.vector_store %arg3[%c0_8, %c0_9], %14 {strides = array<i32>} : memref<128x128xf32, #tpu.memory_space<vmem>>, vector<128x128xf32>,
    %cst_10 = arith.constant dense<0.000000e+00> : vector<128x128xf32>
    %16 = tpu.matmul %14, %14, %cst_10 {dimension_numbers = #tpu.dot_dimension_numbers<[1], [1], [0], [0], [0, 0, 1, 0], [], []>} : vector<128x128xf32>, vector<128x128xf32>, vector<128x128xf32> -> vector<128x128xf32>
    %cst_11 = arith.constant 1.000000e+00 : f32
    %17 = vector.broadcast %cst_11 : f32 to vector<128x128xf32>
    %18 = arith.select %12, %17, %16 : vector<128x128xi1>, vector<128x128xf32>
    %c0_12 = arith.constant 0 : index
    %c0_13 = arith.constant 0 : index
    %19 = vector.load %arg4[%c0_12, %c0_13] : memref<128x128xf32, #tpu.memory_space<vmem>>, vector<128x128xf32>
    tpu.vector_store %arg4[%c0_12, %c0_13], %18 {strides = array<i32>} : memref<128x128xf32, #tpu.memory_space<vmem>>, vector<128x128xf32>,
    return
  }
}

</mosaic_0001>

<bundles_post_ra>
// kernel: tpu_custom_call.1
= control target key start
LH: loop header
LB: loop body
LE: loop exit
PB: predicated region body
PF: predicated region fallthrough
CT: control target
= control target key end

     0   :  { %10 = vsyncpa [#allocation3], 0  ;;  %s1141_s0 = inlined_call_operand.hbm [shape: f32[128,128], index: 0, kind: input, shape index: {}]   ;;  %s1142_s1 = inlined_call_operand.hbm [shape: bf16[64,64], index: 1, kind: input, shape index: {}]   ;;  %s1143_s2 = inlined_call_operand.hbm [shape: bf16[64,128], index: 2, kind: input, shape index: {}]   ;;  %s1144_s3 = inlined_call_operand.hbm [shape: f32[128,128], index: 3, kind: output, shape index: {0}]   ;;  %s1145_s4 = inlined_call_operand.hbm [shape: f32[128,128], index: 4, kind: output, shape index: {1}]  }
   0x1   :  { %11 = vsyncpa [#allocation6], 0 }
   0x2   :  { %12 = vsyncpa [#allocation4], 0  ;;  %s31_s17 = sshll.u32 %s1142_s1, 4  ;;  %s32_s17 = int_to_ptr.hbm [resolvable:$true] %s31_s17 }
   0x3   :  { %13 = vsyncpa [#allocation10], 0  ;;  %s776_s18 = smov [#allocation5]   ;;  %s18_s22 = sshll.u32 %s1141_s0, 4  ;;  %s19_s22 = int_to_ptr.hbm [resolvable:$true] %s18_s22 }
   0x4   :  { %s33_s19 = sshll.u32 %s776_s18, 4  ;;  %s777_s23 = smov 64   ;;  %s34_s19 = int_to_ptr.vmem [resolvable:$true] %s33_s19 }
   0x5   :  { %s778_s24 = smov 4   ;;  %s779_s25 = smov [#allocation2]  }
   0x6   :  { %39 = dma.hbm_to_vmem [thread:$0]  %s32_s17, 512, %s34_s19, [#allocation6], %s777_s23, %s777_s23, %s778_s24  }
   0x7   :  { %s20_s26 = sshll.u32 %s779_s25, 4  ;;  %s780_s27 = smov 128   ;;  %s21_s26 = int_to_ptr.vmem [resolvable:$true] %s20_s26 }
   0x8   :  { %s781_s1 = smov 8   ;;  %s44_s30 = sshll.u32 %s1143_s2, 4  ;;  %s45_s30 = int_to_ptr.hbm [resolvable:$true] %s44_s30 }
   0x9   :  { %26 = dma.hbm_to_vmem [thread:$0]  %s19_s22, 2048, %s21_s26, [#allocation3], %s780_s27, %s780_s27, %s781_s1  }
   0xa   :  { %s782_s0 = smov [#allocation7]  }
   0xb   :  { %s46_s5 = sshll.u32 %s782_s0, 4  ;;  %s47_s5 = int_to_ptr.vmem [resolvable:$true] %s46_s5 }
   0xc   :  { %52 = dma.hbm_to_vmem [thread:$0]  %s45_s30, 512, %s47_s5, [#allocation6], %s777_s23, %s777_s23, %s778_s24  }
   0xd   :  { %768 = dma.done.wait [#allocation3], 2048  }
   0xe   :  { %769 = vsyncadd [#allocation3], 4294965248 }
   0xf   :  { %770 = dma.done.wait [#allocation6], 1024  }
  0x10   :  { %771 = vsyncadd [#allocation6], 4294966272  ;;  %v618_v0 = vld [vmem:[#allocation7 + $0x18] sm:$0xff]  ;;  %v617_v1 = vld [vmem:[#allocation7 + $0x10] sm:$0xff]  ;;  %vm222_vm0 = vcmask 523264   ;;  %s783_s2 = smov [#allocation8]  }
  0x11   :  { %239 = vmatpush.bf16.msra.mxu0 %v618_v0  ;;  %v616_v2 = vld [vmem:[#allocation7 + $0x8] sm:$0xff]  ;;  %v615_v3 = vld [vmem:[#allocation7] sm:$0xff]  ;;  %v68_v6 = vld [vmem:[#allocation2 + $0x10] sm:$0xff]  ;;  %s533_s6 = sshll.u32 %s783_s2, 4  ;;  %s535_s9 = sshll.u32 %s1144_s3, 4  ;;  %s534_s6 = int_to_ptr.vmem [resolvable:$true] %s533_s6  ;;  %s536_s9 = int_to_ptr.hbm [resolvable:$true] %s535_s9 }
  0x12   :  { %v611_v4 = vld [vmem:[#allocation5] sm:$0xff]  ;;  %v612_v5 = vld [vmem:[#allocation5 + $0x8] sm:$0xff]  ;;  %102 = vrot.lane.b32.xlu0 %v68_v6, %s777_s23  ;;  %v830_v8 = vld [vmem:[#allocation2 + $0x30] sm:$0xff]  ;;  %s784_s3 = smov [#allocation9]   ;;  %s548_s13 = sshll.u32 %s1145_s4, 4  ;;  %s549_s13 = int_to_ptr.hbm [resolvable:$true] %s548_s13 }
  0x13   :  { %v70_v7 = vld [vmem:[#allocation2 + $0x20] sm:$0xff]  ;;  %110 = vrot.lane.b32.xlu2 %v830_v8, %s777_s23  ;;  %v69_v9 = vld [vmem:[#allocation2 + $0x18] sm:$0xff]  ;;  %v71_v10 = vld [vmem:[#allocation2 + $0x28] sm:$0xff]  ;;  %s546_s10 = sshll.u32 %s784_s3, 4  ;;  %s547_s10 = int_to_ptr.vmem [resolvable:$true] %s546_s10 }
  0x14   :  { %106 = vrot.lane.b32.xlu1 %v70_v7, %s777_s23  ;;  %v613_v11 = vld [vmem:[#allocation5 + $0x10] sm:$0xff]  ;;  %v614_v12 = vld [vmem:[#allocation5 + $0x18] sm:$0xff]  ;;  %v75_v14 = vld [vmem:[#allocation2 + $0x48] sm:$0xff] }
  0x15   :  { %240 = vmatpush.bf16.msra.mxu0 %v617_v1  ;;  %v73_v13 = vld [vmem:[#allocation2 + $0x38] sm:$0xff]  ;;  %v74_v15 = vld [vmem:[#allocation2 + $0x40] sm:$0xff]  ;;  %v76_v20 = vld [vmem:[#allocation2 + $0x50] sm:$0xff] }
  0x16   :  { %v841_v16 = vld [vmem:[#allocation2 + $0x58] sm:$0xff]  ;;  %v845_v18 = vld [vmem:[#allocation2 + $0x60] sm:$0xff]  ;;  %v852_v23 = vld [vmem:[#allocation2 + $0x70] sm:$0xff] }
  0x17   :  { %v850_v22 = vld [vmem:[#allocation2 + $0x78] sm:$0xff]  ;;  %v79_v25 = vld [vmem:[#allocation2 + $0x68] sm:$0xff]  ;;  %v66_v46 = vld [vmem:[#allocation2] sm:$0xff] }
  0x18   :  { %v67_v32 = vld [vmem:[#allocation2 + $0x8] sm:$0xff] }
  0x19   :  { %241 = vmatpush.bf16.msra.mxu0 %v616_v2 }
  0x1a   :  { %104 = vrot.lane.b32.xlu0 %v69_v9, %s777_s23 }
  0x1b   :  { %112 = vrot.lane.b32.xlu2 %v73_v13, %s777_s23 }
  0x1c   :  { %108 = vrot.lane.b32.xlu1 %v71_v10, %s777_s23 }
  0x1d   :  { %242 = vmatpush.bf16.msra.mxu0 %v615_v3 }
  0x20   :  { %599 = vmatmul.msk.bf16.vlgmr.msra.gmra.mxu0 %vm222_vm0, %v611_v4 }
  0x22   :  { %114 = vrot.lane.b32.xlu0 %v74_v15, %s777_s23 }
  0x23   :  { %118 = vrot.lane.b32.xlu2 %v76_v20, %s777_s23 }
  0x24   :  { %116 = vrot.lane.b32.xlu1 %v75_v14, %s777_s23 }
  0x2a   :  { %120 = vrot.lane.b32.xlu0 %v841_v16, %s777_s23 }
  0x2b   :  { %124 = vrot.lane.b32.xlu2 %v79_v25, %s777_s23 }
  0x2c   :  { %122 = vrot.lane.b32.xlu1 %v845_v18, %s777_s23 }
  0x30   :  { %600 = vmatmul.msk.bf16.gmra.mxu0 %vm222_vm0, %v612_v5 }
  0x32   :  { %126 = vrot.lane.b32.xlu0 %v852_v23, %s777_s23 }
  0x33   :  { %98 = vrot.lane.b32.xlu2 %v66_v46, %s777_s23 }
  0x34   :  { %128 = vrot.lane.b32.xlu1 %v850_v22, %s777_s23 }
  0x3a   :  { %100 = vrot.lane.b32.xlu0 %v67_v32, %s777_s23 }
  0x40   :  { %601 = vmatmul.msk.bf16.gmra.mxu0 %vm222_vm0, %v613_v11 }
  0x50   :  { %602 = vmatmul.msk.bf16.gmra.mxu0 %vm222_vm0, %v614_v12  ;;  %v365_v12 = vlaneseq }
  0x6d   :  { %v111_v44 = vpop.permute.xlu2 %110 }
  0x6e   :  { %v152_v48 = vadd.f32 %v111_v44, %v830_v8 }
  0x75   :  { %v113_v47 = vpop.permute.xlu2 %112 }
  0x76   :  { %v153_v49 = vadd.f32 %v113_v47, %v73_v13  ;;  %v874_v13 = vshrl.u32 %v365_v12, 7 }
  0x78   :  { %v267_v50 = vpack.c.bf16 %v153_v49, %v152_v48  ;;  %v967_v47 = vadd.s32 80, %v874_v13 }
  0x7d   :  { %v119_v56 = vpop.permute.xlu2 %118 }
  0x7e   :  { %v156_v58 = vadd.f32 %v119_v56, %v76_v20 }
  0x84   :  { %v103_v29 = vpop.permute.xlu0 %102 }
  0x85   :  { %v148_v36 = vadd.f32 %v103_v29, %v68_v6  ;;  %v125_v61 = vpop.permute.xlu2 %124 }
  0x86   :  { %v107_v39 = vpop.permute.xlu1 %106  ;;  %v159_v63 = vadd.f32 %v125_v61, %v79_v25 }
  0x87   :  { %v150_v42 = vadd.f32 %v107_v39, %v70_v7  ;;  %v945_v39 = vadd.s32 64, %v874_v13 }
  0x8c   :  { %v105_v35 = vpop.permute.xlu0 %104 }
  0x8d   :  { %v149_v37 = vadd.f32 %v105_v35, %v69_v9  ;;  %v99_v9 = vpop.permute.xlu2 %98  ;;  %v934_v35 = vadd.s32 56, %v874_v13 }
  0x8e   :  { %v109_v41 = vpop.permute.xlu1 %108 }
  0x8f   :  { %v265_v40 = vpack.c.bf16 %v149_v37, %v148_v36  ;;  %v151_v43 = vadd.f32 %v109_v41, %v71_v10  ;;  %v146_v10 = vadd.f32 %v99_v9, %v66_v46 }
  0x91   :  { %v266_v45 = vpack.c.bf16 %v151_v43, %v150_v42  ;;  %v956_v43 = vadd.s32 72, %v874_v13 }
  0x94   :  { %v115_v52 = vpop.permute.xlu0 %114 }
  0x95   :  { %v154_v54 = vadd.f32 %v115_v52, %v74_v15  ;;  %v879_v15 = vand.u32 127, %v365_v12 }
  0x96   :  { %v117_v51 = vpop.permute.xlu1 %116 }
  0x97   :  { %v155_v53 = vadd.f32 %v117_v51, %v75_v14  ;;  %v877_v14 = vadd.s32 16, %v874_v13  ;;  %vm391_vm6 = vcmp.eq.s32.totalorder %v934_v35, %v879_v15  ;;  %vm392_vm7 = vcmp.eq.s32.totalorder %v945_v39, %v879_v15 }
  0x98   :  { %vm393_vm8 = vcmp.eq.s32.totalorder %v956_v43, %v879_v15  ;;  %vm394_vm9 = vcmp.eq.s32.totalorder %v967_v47, %v879_v15  ;;  %v978_v51 = vadd.s32 88, %v874_v13  ;;  %vm384_vm15 = vcmp.eq.s32.totalorder %v874_v13, %v879_v15 }
  0x99   :  { %v268_v55 = vpack.c.bf16 %v155_v53, %v154_v54  ;;  %vm386_vm1 = vcmp.eq.s32.totalorder %v877_v14, %v879_v15 }
  0x9a   :  { %vm395_vm10 = vcmp.eq.s32.totalorder %v978_v51, %v879_v15 }
  0x9c   :  { %v121_v57 = vpop.permute.xlu0 %120 }
  0x9d   :  { %v244_v17 = vpop.f32.mrf.mxu0  ;;  %v157_v59 = vadd.f32 %v121_v57, %v841_v16 }
  0x9e   :  { %v123_v62 = vpop.permute.xlu1 %122 }
  0x9f   :  { %v269_v60 = vpack.c.bf16 %v157_v59, %v156_v58  ;;  %v158_v0 = vadd.f32 %v123_v62, %v845_v18  ;;  %v1000_v59 = vadd.s32 104, %v874_v13 }
  0xa1   :  { %v270_v1 = vpack.c.bf16 %v159_v63, %v158_v0  ;;  %vm397_vm12 = vcmp.eq.s32.totalorder %v1000_v59, %v879_v15  ;;  %v1011_v63 = vadd.s32 112, %v874_v13 }
  0xa3   :  { %vm398_vm13 = vcmp.eq.s32.totalorder %v1011_v63, %v879_v15 }
  0xa4   :  { %v127_v3 = vpop.permute.xlu0 %126 }
  0xa5   :  { %v246_v19 = vpop.f32.mrf.mxu0  ;;  %v160_v5 = vadd.f32 %v127_v3, %v852_v23  ;;  %v901_v23 = vadd.s32 32, %v874_v13  ;;  %v1022_v3 = vadd.s32 120, %v874_v13 }
  0xa6   :  { %v272_v38 = vpack.c.bf16 %v246_v19, %v244_v17  ;;  %v129_v2 = vpop.permute.xlu1 %128  ;;  %v890_v19 = vadd.s32 24, %v874_v13 }
  0xa7   :  { %v161_v4 = vadd.f32 %v129_v2, %v850_v22  ;;  %vm388_vm3 = vcmp.eq.s32.totalorder %v901_v23, %v879_v15  ;;  %vm399_vm14 = vcmp.eq.s32.totalorder %v1022_v3, %v879_v15 }
  0xa8   :  { %vm387_vm2 = vcmp.eq.s32.totalorder %v890_v19, %v879_v15 }
  0xa9   :  { %v271_v6 = vpack.c.bf16 %v161_v4, %v160_v5 }
  0xac   :  { %v101_v7 = vpop.permute.xlu0 %100 }
  0xad   :  { %v249_v21 = vpop.f32.mrf.mxu0  ;;  %v147_v8 = vadd.f32 %v101_v7, %v67_v32 }
  0xaf   :  { %v264_v11 = vpack.c.bf16 %v147_v8, %v146_v10  ;;  %v1039_v10 = vadd.s32 8, %v874_v13 }
  0xb5   :  { %v251_v24 = vpop.f32.mrf.mxu0 }
  0xb6   :  { %v273_v34 = vpack.c.bf16 %v251_v24, %v249_v21 }
  0xbd   :  { %v254_v26 = vpop.f32.mrf.mxu0 }
  0xc5   :  { %v256_v27 = vpop.f32.mrf.mxu0 }
  0xc6   :  { %v274_v33 = vpack.c.bf16 %v256_v27, %v254_v26  ;;  %v912_v27 = vadd.s32 40, %v874_v13 }
  0xc8   :  { %vm389_vm4 = vcmp.eq.s32.totalorder %v912_v27, %v879_v15 }
  0xcd   :  { %v259_v28 = vpop.f32.mrf.mxu0 }
  0xd5   :  { %v261_v30 = vpop.f32.mrf.mxu0 }
  0xd6   :  { %v275_v31 = vpack.c.bf16 %v261_v30, %v259_v28 }
  0xd8   :  { %304 = vmatpush.bf16.msrb.mxu0 %v275_v31  ;;  %619 = vmatpush.bf16.msra.mxu1 %v275_v31  ;;  %v923_v31 = vadd.s32 48, %v874_v13 }
  0xda   :  { %vm390_vm5 = vcmp.eq.s32.totalorder %v923_v31, %v879_v15 }
  0xdc   :  { %305 = vmatpush.bf16.msrb.mxu0 %v274_v33  ;;  %620 = vmatpush.bf16.msra.mxu1 %v274_v33 }
  0xe0   :  { %306 = vmatpush.bf16.msrb.mxu0 %v273_v34  ;;  %621 = vmatpush.bf16.msra.mxu1 %v273_v34 }
  0xe4   :  { %307 = vmatpush.bf16.msrb.mxu0 %v272_v38  ;;  %622 = vmatpush.bf16.msra.mxu1 %v272_v38 }
  0xe7   :  { %604 = vmatmul.msk.bf16.vlgmr.msra.gmra.mxu1 %vm222_vm0, %v265_v40  ;;  %603 = vmatmul.msk.bf16.vlgmr.msrb.gmra.mxu0 %vm222_vm0, %v264_v11 }
  0xf7   :  { %605 = vmatmul.msk.bf16.gmra.mxu1 %vm222_vm0, %v266_v45 }
 0x107   :  { %606 = vmatmul.msk.bf16.gmra.mxu1 %vm222_vm0, %v267_v50 }
 0x117   :  { %607 = vmatmul.msk.bf16.gmra.mxu1 %vm222_vm0, %v268_v55  ;;  %v989_v55 = vadd.s32 96, %v874_v13 }
 0x119   :  { %vm396_vm11 = vcmp.eq.s32.totalorder %v989_v55, %v879_v15 }
 0x127   :  { %608 = vmatmul.msk.bf16.gmra.mxu1 %vm222_vm0, %v269_v60 }
 0x137   :  { %609 = vmatmul.msk.bf16.gmra.mxu1 %vm222_vm0, %v270_v1 }
 0x147   :  { %610 = vmatmul.msk.bf16.gmra.mxu1 %vm222_vm0, %v271_v6  ;;  %vm385_vm0 = vcmp.eq.s32.totalorder %v1039_v10, %v879_v15 }
 0x164   :  { %v314_v16 = vpop.f32.mrf.mxu1  ;;  %v309_v7 = vpop.f32.mrf.mxu0 }
 0x165   :  { %v351_v17 = vand.u32 2147483647, %v314_v16  ;;  %v349_v8 = vand.u32 2147483647, %v309_v7 }
 0x167   :  { %v886_v18 = vsel %vm386_vm1, 1.0, %v351_v17  ;;  %v400_v9 = vsel %vm384_vm15, 1.0, %v349_v8 }
 0x168   :  { %418 = vst [vmem:[#allocation8 + $0x10] sm:$0xff] %v886_v18 }
 0x169   :  { %416 = vst [vmem:[#allocation8] sm:$0xff] %v400_v9 }
 0x16c   :  { %v316_v20 = vpop.f32.mrf.mxu1  ;;  %v311_v11 = vpop.f32.mrf.mxu0 }
 0x16d   :  { %v352_v21 = vand.u32 2147483647, %v316_v20  ;;  %v350_v12 = vand.u32 2147483647, %v311_v11 }
 0x16f   :  { %v897_v22 = vsel %vm387_vm2, 1.0, %v352_v21  ;;  %v401_v16 = vsel %vm385_vm0, 1.0, %v350_v12 }
 0x170   :  { %419 = vst [vmem:[#allocation8 + $0x18] sm:$0xff] %v897_v22 }
 0x171   :  { %417 = vst [vmem:[#allocation8 + $0x8] sm:$0xff] %v401_v16 }
 0x174   :  { %v319_v24 = vpop.f32.mrf.mxu1 }
 0x175   :  { %v353_v25 = vand.u32 2147483647, %v319_v24 }
 0x177   :  { %v908_v26 = vsel %vm388_vm3, 1.0, %v353_v25 }
 0x178   :  { %420 = vst [vmem:[#allocation8 + $0x20] sm:$0xff] %v908_v26 }
 0x17c   :  { %v321_v28 = vpop.f32.mrf.mxu1 }
 0x17d   :  { %v354_v29 = vand.u32 2147483647, %v321_v28 }
 0x17f   :  { %v919_v30 = vsel %vm389_vm4, 1.0, %v354_v29 }
 0x180   :  { %421 = vst [vmem:[#allocation8 + $0x28] sm:$0xff] %v919_v30 }
 0x184   :  { %v324_v32 = vpop.f32.mrf.mxu1 }
 0x185   :  { %v355_v33 = vand.u32 2147483647, %v324_v32 }
 0x187   :  { %v930_v34 = vsel %vm390_vm5, 1.0, %v355_v33 }
 0x188   :  { %422 = vst [vmem:[#allocation8 + $0x30] sm:$0xff] %v930_v34 }
 0x18c   :  { %v326_v36 = vpop.f32.mrf.mxu1 }
 0x18d   :  { %v356_v37 = vand.u32 2147483647, %v326_v36 }
 0x18f   :  { %v941_v38 = vsel %vm391_vm6, 1.0, %v356_v37 }
 0x190   :  { %423 = vst [vmem:[#allocation8 + $0x38] sm:$0xff] %v941_v38 }
 0x194   :  { %v329_v40 = vpop.f32.mrf.mxu1 }
 0x195   :  { %v357_v41 = vand.u32 2147483647, %v329_v40 }
 0x197   :  { %v952_v42 = vsel %vm392_vm7, 1.0, %v357_v41 }
 0x198   :  { %424 = vst [vmem:[#allocation8 + $0x40] sm:$0xff] %v952_v42 }
 0x19c   :  { %v331_v44 = vpop.f32.mrf.mxu1 }
 0x19d   :  { %v358_v45 = vand.u32 2147483647, %v331_v44 }
 0x19f   :  { %v963_v46 = vsel %vm393_vm8, 1.0, %v358_v45 }
 0x1a0   :  { %425 = vst [vmem:[#allocation8 + $0x48] sm:$0xff] %v963_v46 }
 0x1a4   :  { %v334_v48 = vpop.f32.mrf.mxu1 }
 0x1a5   :  { %v359_v49 = vand.u32 2147483647, %v334_v48 }
 0x1a7   :  { %v974_v50 = vsel %vm394_vm9, 1.0, %v359_v49 }
 0x1a8   :  { %426 = vst [vmem:[#allocation8 + $0x50] sm:$0xff] %v974_v50 }
 0x1ac   :  { %v336_v52 = vpop.f32.mrf.mxu1 }
 0x1ad   :  { %v360_v53 = vand.u32 2147483647, %v336_v52 }
 0x1af   :  { %v985_v54 = vsel %vm395_vm10, 1.0, %v360_v53 }
 0x1b0   :  { %427 = vst [vmem:[#allocation8 + $0x58] sm:$0xff] %v985_v54 }
 0x1b4   :  { %v339_v56 = vpop.f32.mrf.mxu1 }
 0x1b5   :  { %v361_v57 = vand.u32 2147483647, %v339_v56 }
 0x1b7   :  { %v996_v58 = vsel %vm396_vm11, 1.0, %v361_v57 }
 0x1b8   :  { %428 = vst [vmem:[#allocation8 + $0x60] sm:$0xff] %v996_v58 }
 0x1bc   :  { %v341_v60 = vpop.f32.mrf.mxu1 }
 0x1bd   :  { %v362_v61 = vand.u32 2147483647, %v341_v60 }
 0x1bf   :  { %v1007_v62 = vsel %vm397_vm12, 1.0, %v362_v61 }
 0x1c0   :  { %429 = vst [vmem:[#allocation8 + $0x68] sm:$0xff] %v1007_v62 }
 0x1c4   :  { %v344_v0 = vpop.f32.mrf.mxu1 }
 0x1c5   :  { %v363_v1 = vand.u32 2147483647, %v344_v0 }
 0x1c7   :  { %v1018_v2 = vsel %vm398_vm13, 1.0, %v363_v1 }
 0x1c8   :  { %430 = vst [vmem:[#allocation8 + $0x70] sm:$0xff] %v1018_v2 }
 0x1cc   :  { %v346_v4 = vpop.f32.mrf.mxu1 }
 0x1cd   :  { %v364_v5 = vand.u32 2147483647, %v346_v4 }
 0x1cf   :  { %v415_v6 = vsel %vm399_vm14, 1.0, %v364_v5 }
 0x1d0   :  { %431 = vst [vmem:[#allocation8 + $0x78] sm:$0xff] %v415_v6  ;;  %432 = vmatpush.xpose.msra.mxu2 %v415_v6  ;;  %623 = vmatpush.xpose.msra.mxu3 %v415_v6 }
 0x1d1   :  { %541 = dma.vmem_to_hbm [thread:$0]  %s534_s6, 2048, %s536_s9, [#allocation4], %s780_s27, %s780_s27, %s781_s1  }
 0x1d4   :  { %433 = vmatpush.xpose.msra.mxu2 %v1018_v2  ;;  %624 = vmatpush.xpose.msra.mxu3 %v1018_v2 }
 0x1d8   :  { %434 = vmatpush.xpose.msra.mxu2 %v1007_v62  ;;  %625 = vmatpush.xpose.msra.mxu3 %v1007_v62 }
 0x1dc   :  { %435 = vmatpush.xpose.msra.mxu2 %v996_v58  ;;  %626 = vmatpush.xpose.msra.mxu3 %v996_v58 }
 0x1e0   :  { %436 = vmatpush.xpose.msra.mxu2 %v985_v54  ;;  %627 = vmatpush.xpose.msra.mxu3 %v985_v54 }
 0x1e4   :  { %437 = vmatpush.xpose.msra.mxu2 %v974_v50  ;;  %628 = vmatpush.xpose.msra.mxu3 %v974_v50 }
 0x1e8   :  { %438 = vmatpush.xpose.msra.mxu2 %v963_v46  ;;  %629 = vmatpush.xpose.msra.mxu3 %v963_v46 }
 0x1ec   :  { %439 = vmatpush.xpose.msra.mxu2 %v952_v42  ;;  %630 = vmatpush.xpose.msra.mxu3 %v952_v42 }
 0x1f0   :  { %440 = vmatpush.xpose.msra.mxu2 %v941_v38  ;;  %631 = vmatpush.xpose.msra.mxu3 %v941_v38 }
 0x1f4   :  { %441 = vmatpush.xpose.msra.mxu2 %v930_v34  ;;  %632 = vmatpush.xpose.msra.mxu3 %v930_v34 }
 0x1f8   :  { %442 = vmatpush.xpose.msra.mxu2 %v919_v30  ;;  %633 = vmatpush.xpose.msra.mxu3 %v919_v30 }
 0x1fc   :  { %443 = vmatpush.xpose.msra.mxu2 %v908_v26  ;;  %634 = vmatpush.xpose.msra.mxu3 %v908_v26 }
 0x200   :  { %444 = vmatpush.xpose.msra.mxu2 %v897_v22  ;;  %635 = vmatpush.xpose.msra.mxu3 %v897_v22 }
 0x204   :  { %445 = vmatpush.xpose.msra.mxu2 %v886_v18  ;;  %636 = vmatpush.xpose.msra.mxu3 %v886_v18 }
 0x208   :  { %446 = vmatpush.xpose.msra.mxu2 %v401_v16  ;;  %637 = vmatpush.xpose.msra.mxu3 %v401_v16 }
 0x20c   :  { %447 = vmatpush.xpose.msra.mxu2 %v400_v9  ;;  %638 = vmatpush.xpose.msra.mxu3 %v400_v9 }
 0x20f   :  { %448 = vmatmul.f32.vlgmr.msra.gmra.mxu2 %v400_v9  ;;  %469 = vmatmul.f32.vlgmr.msra.gmra.mxu3 %v941_v38 }
 0x217   :  { %451 = vmatmul.f32.gmra.mxu2 %v401_v16  ;;  %472 = vmatmul.f32.gmra.mxu3 %v952_v42 }
 0x21f   :  { %454 = vmatmul.f32.gmra.mxu2 %v886_v18  ;;  %475 = vmatmul.f32.gmra.mxu3 %v963_v46 }
 0x227   :  { %457 = vmatmul.f32.gmra.mxu2 %v897_v22  ;;  %478 = vmatmul.f32.gmra.mxu3 %v974_v50 }
 0x22f   :  { %460 = vmatmul.f32.gmra.mxu2 %v908_v26  ;;  %481 = vmatmul.f32.gmra.mxu3 %v985_v54 }
 0x237   :  { %463 = vmatmul.f32.gmra.mxu2 %v919_v30  ;;  %484 = vmatmul.f32.gmra.mxu3 %v996_v58 }
 0x23f   :  { %466 = vmatmul.f32.gmra.mxu2 %v930_v34  ;;  %487 = vmatmul.f32.gmra.mxu3 %v1007_v62 }
 0x247   :  { %490 = vmatmul.f32.gmra.mxu3 %v1018_v2 }
 0x24f   :  { %493 = vmatmul.f32.gmra.mxu3 %v415_v6 }
 0x292   :  { %v449_v17 = vpop.f32.mrf.mxu2  ;;  %v470_v18 = vpop.f32.mrf.mxu3 }
 0x293   :  { %v497_v20 = vsel %vm384_vm15, 1.0, %v449_v17  ;;  %v504_v21 = vsel %vm391_vm6, 1.0, %v470_v18 }
 0x294   :  { %513 = vst [vmem:[#allocation9] sm:$0xff] %v497_v20 }
 0x295   :  { %520 = vst [vmem:[#allocation9 + $0x38] sm:$0xff] %v504_v21 }
 0x29a   :  { %v452_v22 = vpop.f32.mrf.mxu2  ;;  %v473_v24 = vpop.f32.mrf.mxu3 }
 0x29b   :  { %v498_v25 = vsel %vm385_vm0, 1.0, %v452_v22  ;;  %v505_v26 = vsel %vm392_vm7, 1.0, %v473_v24 }
 0x29c   :  { %514 = vst [vmem:[#allocation9 + $0x8] sm:$0xff] %v498_v25 }
 0x29d   :  { %521 = vst [vmem:[#allocation9 + $0x40] sm:$0xff] %v505_v26 }
 0x2a2   :  { %v455_v13 = vpop.f32.mrf.mxu2  ;;  %v476_v28 = vpop.f32.mrf.mxu3 }
 0x2a3   :  { %v499_v29 = vsel %vm386_vm1, 1.0, %v455_v13  ;;  %v506_v30 = vsel %vm393_vm8, 1.0, %v476_v28 }
 0x2a4   :  { %515 = vst [vmem:[#allocation9 + $0x10] sm:$0xff] %v499_v29 }
 0x2a5   :  { %522 = vst [vmem:[#allocation9 + $0x48] sm:$0xff] %v506_v30 }
 0x2aa   :  { %v458_v32 = vpop.f32.mrf.mxu2  ;;  %v479_v33 = vpop.f32.mrf.mxu3 }
 0x2ab   :  { %v500_v34 = vsel %vm387_vm2, 1.0, %v458_v32  ;;  %v507_v35 = vsel %vm394_vm9, 1.0, %v479_v33 }
 0x2ac   :  { %516 = vst [vmem:[#allocation9 + $0x18] sm:$0xff] %v500_v34 }
 0x2ad   :  { %523 = vst [vmem:[#allocation9 + $0x50] sm:$0xff] %v507_v35 }
 0x2b2   :  { %v461_v14 = vpop.f32.mrf.mxu2  ;;  %v482_v36 = vpop.f32.mrf.mxu3 }
 0x2b3   :  { %v501_v37 = vsel %vm388_vm3, 1.0, %v461_v14  ;;  %v508_v38 = vsel %vm395_vm10, 1.0, %v482_v36 }
 0x2b4   :  { %517 = vst [vmem:[#allocation9 + $0x20] sm:$0xff] %v501_v37 }
 0x2b5   :  { %524 = vst [vmem:[#allocation9 + $0x58] sm:$0xff] %v508_v38 }
 0x2ba   :  { %v464_v19 = vpop.f32.mrf.mxu2  ;;  %v485_v39 = vpop.f32.mrf.mxu3 }
 0x2bb   :  { %v502_v40 = vsel %vm389_vm4, 1.0, %v464_v19  ;;  %v509_v41 = vsel %vm396_vm11, 1.0, %v485_v39 }
 0x2bc   :  { %518 = vst [vmem:[#allocation9 + $0x28] sm:$0xff] %v502_v40 }
 0x2bd   :  { %525 = vst [vmem:[#allocation9 + $0x60] sm:$0xff] %v509_v41 }
 0x2c2   :  { %v467_v23 = vpop.f32.mrf.mxu2  ;;  %v488_v42 = vpop.f32.mrf.mxu3 }
 0x2c3   :  { %v503_v43 = vsel %vm390_vm5, 1.0, %v467_v23  ;;  %v510_v44 = vsel %vm397_vm12, 1.0, %v488_v42 }
 0x2c4   :  { %519 = vst [vmem:[#allocation9 + $0x30] sm:$0xff] %v503_v43 }
 0x2c5   :  { %526 = vst [vmem:[#allocation9 + $0x68] sm:$0xff] %v510_v44 }
 0x2ca   :  { %v491_v27 = vpop.f32.mrf.mxu3 }
 0x2cb   :  { %v511_v45 = vsel %vm398_vm13, 1.0, %v491_v27 }
 0x2cc   :  { %527 = vst [vmem:[#allocation9 + $0x70] sm:$0xff] %v511_v45 }
 0x2d2   :  { %v494_v31 = vpop.f32.mrf.mxu3 }
 0x2d3   :  { %v512_v46 = vsel %vm399_vm14, 1.0, %v494_v31 }
 0x2d4   :  { %528 = vst [vmem:[#allocation9 + $0x78] sm:$0xff] %v512_v46 }
 0x2d5   :  { %554 = dma.vmem_to_hbm [thread:$0]  %s547_s10, 2048, %s549_s13, [#allocation10], %s780_s27, %s780_s27, %s781_s1  }
 0x2d6   :  { %772 = dma.done.wait [#allocation4], 2048  }
 0x2d7   :  { %773 = vsyncadd [#allocation4], 4294965248 }
 0x2d8   :  { %774 = dma.done.wait [#allocation10], 2048  }
 0x2d9   :  { %775 = vsyncadd [#allocation10], 4294965248 }
 0x2da   :  { %563 = vsyncpa [#allocation3], 1 }
 0x2db   :  { %564 = vsyncpa [#allocation6], 1 }
 0x2dc   :  { %565 = vsyncpa [#allocation4], 1 }
 0x2dd   :  { %566 = vsyncpa [#allocation10], 1 }

</bundles_post_ra>
